<compile_context>
chip_gen: v6e
topology: v6e:2x2x1
jax: 0.10.0
libtpu: 0.0.40
codegen_flags: <defaults>
</compile_context>

<pallas_src>
import math

import jax
import jax.numpy as jnp
from jax.experimental import pallas as pl
from jax.experimental.pallas import tpu as pltpu

SLOPE = 0.2
D_IN = 512
D_HID = 512
D_OUT = 512


def _round_up(n, m):
    return ((n + m - 1) // m) * m


def fusion_mapper_kernel(x_ref, w1_ref, b1_ref, w2_ref, b2_ref, o_ref):
    # x_ref: (bb, 512) f32 | w*: (512, 512) bf16 | b*: (1, 512) f32
    # Cast to bf16 in-kernel (free on the VPU; kernel is HBM/MXU bound).
    x = x_ref[...].astype(jnp.bfloat16)

    # Layer 1: bf16 matmul, f32 accumulate, f32 bias + LeakyReLU.
    h = jnp.dot(x, w1_ref[...], preferred_element_type=jnp.float32)
    h = h + b1_ref[...]                      # broadcast (1,512) -> (bb,512)
    h = jnp.maximum(h, SLOPE * h)            # LeakyReLU (slope < 1)

    # Layer 2: cast activation back to bf16 for the MXU, accumulate f32.
    y = jnp.dot(h.astype(jnp.bfloat16), w2_ref[...],
                preferred_element_type=jnp.float32)
    y = y + b2_ref[...]

    o_ref[...] = y.astype(o_ref.dtype)


def fusion_mapper(x, params, *, block_b=1024, out_dtype=jnp.float32):
    """x: [B, 512] float32. params: ((W1[512,512], b1[1,512]), (W2, b2)).

    Weights are stored pre-transposed as [in, out] (y = x @ W + b, matching
    PyTorch's x @ W_pt.T + b) and are cast to bf16 for the kernel.
    Set out_dtype=jnp.bfloat16 if downstream accepts it (cuts output HBM
    traffic on memory-bound v6e/v7x).
    """
    B, d_in = x.shape
    assert d_in == D_IN

    (w1, b1), (w2, b2) = params
    w1 = w1.astype(jnp.bfloat16)
    w2 = w2.astype(jnp.bfloat16)
    b1 = b1.astype(jnp.float32).reshape(1, D_HID)
    b2 = b2.astype(jnp.float32).reshape(1, D_OUT)
    x = x.astype(jnp.float32)

    # Batch tile: big tiles amortize per-step overhead; 16-row granularity
    # matches the bf16 (16,128) native tile.  Tiny batches (< 16) use a
    # single full-extent block (block dim == array dim is always legal).
    if B >= 16:
        bb = min(block_b, _round_up(B, 16))
        # Guarantee >= 2 grid steps so dimension_semantics=("parallel",)
        # can shard across both v7x TensorCores (harmless elsewhere).
        if B > 16 and pl.cdiv(B, bb) < 2:
            bb = _round_up(pl.cdiv(_round_up(B, 16), 2), 16)
    else:
        bb = B

    grid = (pl.cdiv(B, bb),)

    # Advisory cost estimate based on the actual in-kernel HBM traffic.
    out_itemsize = jnp.dtype(out_dtype).itemsize
    bytes_accessed = (
        B * D_IN * 4                          # f32 input
        + (w1.size + w2.size) * 2             # bf16 weights
        + (b1.size + b2.size) * 4             # f32 biases
        + B * D_OUT * out_itemsize            # output
    )
    cost = pl.CostEstimate(
        flops=2 * B * (D_IN * D_HID + D_HID * D_OUT),
        transcendentals=0,
        bytes_accessed=bytes_accessed,
    )

    out = pl.pallas_call(
        fusion_mapper_kernel,
        out_shape=jax.ShapeDtypeStruct((B, D_OUT), out_dtype),
        grid_spec=pltpu.PrefetchScalarGridSpec(
            num_scalar_prefetch=0,
            grid=grid,
            in_specs=[
                pl.BlockSpec((bb, D_IN), lambda i: (i, 0)),
                pl.BlockSpec((D_IN, D_HID), lambda i: (0, 0)),   # resident
                pl.BlockSpec((1, D_HID), lambda i: (0, 0)),
                pl.BlockSpec((D_HID, D_OUT), lambda i: (0, 0)),  # resident
                pl.BlockSpec((1, D_OUT), lambda i: (0, 0)),
            ],
            out_specs=pl.BlockSpec((bb, D_OUT), lambda i: (i, 0)),
        ),
        compiler_params=pltpu.CompilerParams(
            dimension_semantics=("parallel",),
            # 1024-row f32 tiles (double-buffered x + y) + bf16 weights +
            # intermediates ~ 16 MiB; leave headroom but stay under the
            # v7x 64 MiB physical VMEM.
            vmem_limit_bytes=48 * 1024 * 1024,
        ),
        cost_estimate=cost,
    )(x, w1, b1, w2, b2)

    return out


def init_params(key):
    """kaiming_normal_(a=0.2, fan_in) weights, zero biases (f32 masters).

    std = sqrt(2 / (1 + a^2)) / sqrt(fan_in).  Weights generated directly in
    [in, out] layout (transpose of PyTorch's [out, in]); statistically
    identical since entries are iid normal.
    """
    params = []
    for fan_in, fan_out in ((D_IN, D_HID), (D_HID, D_OUT)):
        key, sub = jax.random.split(key)
        gain = math.sqrt(2.0 / (1.0 + SLOPE ** 2))
        std = gain / math.sqrt(fan_in)
        w = std * jax.random.normal(sub, (fan_in, fan_out), dtype=jnp.float32)
        b = jnp.zeros((1, fan_out), dtype=jnp.float32)
        params.append((w, b))
    return params


def reference_forward(x, params):
    """Numerics-matched reference: bf16 weights/activations, f32 accumulate."""
    (w1, b1), (w2, b2) = params
    h = jnp.dot(x.astype(jnp.bfloat16), w1.astype(jnp.bfloat16),
                preferred_element_type=jnp.float32) + b1
    h = jnp.maximum(h, SLOPE * h)
    y = jnp.dot(h.astype(jnp.bfloat16), w2.astype(jnp.bfloat16),
                preferred_element_type=jnp.float32) + b2
    return y


def reference_forward_f32(x, params):
    h = x
    for idx, (w, b) in enumerate(params):
        h = h @ w + b
        if idx == 0:
            h = jnp.where(h > 0, h, SLOPE * h)
    return h


if __name__ == "__main__":
    key = jax.random.PRNGKey(0)
    pkey, xkey = jax.random.split(key)
    params = init_params(pkey)

    # Cover: tiny full-extent block (B=4), 2-step grid with ragged last
    # block (B=24), and a larger 2-step split (B=300).
    for B in (4, 24, 300):
        xk = jax.random.fold_in(xkey, B)
        x = jax.random.normal(xk, (B, D_IN), dtype=jnp.float32)

        out = jax.block_until_ready(fusion_mapper(x, params))
        assert out.shape == (B, D_OUT), (B, out.shape)

        # Tight check vs a bf16-quantized, f32-accumulating reference.
        ref_q = reference_forward(x, params)
        assert jnp.allclose(out, ref_q, atol=2e-3, rtol=2e-3), (
            B, float(jnp.max(jnp.abs(out - ref_q))))

        # Loose sanity check vs the full-f32 PyTorch-equivalent math.
        ref_f32 = reference_forward_f32(x, params)
        assert jnp.allclose(out, ref_f32, atol=6e-2, rtol=6e-2), (
            B, float(jnp.max(jnp.abs(out - ref_f32))))

    print("KERNEL_OK")
</pallas_src>

<mosaic_0001>
module attributes {stable_mosaic.version = 11 : i64} {
  func.func @fusion_mapper_kernel(%arg0: i32, %arg1: memref<4x512xf32, #tpu.memory_space<vmem>>, %arg2: memref<512x512xbf16, #tpu.memory_space<vmem>>, %arg3: memref<1x512xf32, #tpu.memory_space<vmem>>, %arg4: memref<512x512xbf16, #tpu.memory_space<vmem>>, %arg5: memref<1x512xf32, #tpu.memory_space<vmem>>, %arg6: memref<4x512xf32, #tpu.memory_space<vmem>>) attributes {dimension_semantics = [#tpu.dimension_semantics<parallel>], iteration_bounds = array<i64: 1>, scalar_prefetch = 0 : i64, scratch_operands = 0 : i64, tpu.core_type = #tpu.core_type<tc>, window_params = [{transform_indices = @transform_0, window_bounds = array<i64: 4, 512>}, {pipeline_mode = #tpu.pipeline_mode<synchronous>, transform_indices = @transform_1, window_bounds = array<i64: 512, 512>}, {pipeline_mode = #tpu.pipeline_mode<synchronous>, transform_indices = @transform_2, window_bounds = array<i64: 1, 512>}, {pipeline_mode = #tpu.pipeline_mode<synchronous>, transform_indices = @transform_3, window_bounds = array<i64: 512, 512>}, {pipeline_mode = #tpu.pipeline_mode<synchronous>, transform_indices = @transform_4, window_bounds = array<i64: 1, 512>}, {transform_indices = @transform_5, window_bounds = array<i64: 4, 512>}]} {
    %c0 = arith.constant 0 : index
    %c0_0 = arith.constant 0 : index
    %0 = vector.load %arg1[%c0, %c0_0] : memref<4x512xf32, #tpu.memory_space<vmem>>, vector<4x512xf32>
    %1 = arith.truncf %0 : vector<4x512xf32> to vector<4x512xbf16>
    %c0_1 = arith.constant 0 : index
    %c0_2 = arith.constant 0 : index
    %2 = vector.load %arg2[%c0_1, %c0_2] : memref<512x512xbf16, #tpu.memory_space<vmem>>, vector<512x512xbf16>
    %cst = arith.constant dense<0.000000e+00> : vector<4x512xf32>
    %3 = tpu.matmul %1, %2, %cst {dimension_numbers = #tpu.dot_dimension_numbers<[1], [0], [0], [1], [0, 0, 1, 1], [], []>} : vector<4x512xbf16>, vector<512x512xbf16>, vector<4x512xf32> -> vector<4x512xf32>
    %c0_3 = arith.constant 0 : index
    %c0_4 = arith.constant 0 : index
    %4 = vector.load %arg3[%c0_3, %c0_4] : memref<1x512xf32, #tpu.memory_space<vmem>>, vector<1x512xf32>
    %5 = vector.broadcast %4 : vector<1x512xf32> to vector<4x512xf32>
    %6 = arith.addf %3, %5 : vector<4x512xf32>
    %cst_5 = arith.constant 2.000000e-01 : f32
    %7 = vector.broadcast %cst_5 : f32 to vector<4x512xf32>
    %8 = arith.mulf %7, %6 : vector<4x512xf32>
    %9 = arith.maximumf %6, %8 : vector<4x512xf32>
    %10 = arith.truncf %9 : vector<4x512xf32> to vector<4x512xbf16>
    %c0_6 = arith.constant 0 : index
    %c0_7 = arith.constant 0 : index
    %11 = vector.load %arg4[%c0_6, %c0_7] : memref<512x512xbf16, #tpu.memory_space<vmem>>, vector<512x512xbf16>
    %cst_8 = arith.constant dense<0.000000e+00> : vector<4x512xf32>
    %12 = tpu.matmul %10, %11, %cst_8 {dimension_numbers = #tpu.dot_dimension_numbers<[1], [0], [0], [1], [0, 0, 1, 1], [], []>} : vector<4x512xbf16>, vector<512x512xbf16>, vector<4x512xf32> -> vector<4x512xf32>
    %c0_9 = arith.constant 0 : index
    %c0_10 = arith.constant 0 : index
    %13 = vector.load %arg5[%c0_9, %c0_10] : memref<1x512xf32, #tpu.memory_space<vmem>>, vector<1x512xf32>
    %14 = vector.broadcast %13 : vector<1x512xf32> to vector<4x512xf32>
    %15 = arith.addf %12, %14 : vector<4x512xf32>
    %c0_11 = arith.constant 0 : index
    %c0_12 = arith.constant 0 : index
    %16 = vector.load %arg6[%c0_11, %c0_12] : memref<4x512xf32, #tpu.memory_space<vmem>>, vector<4x512xf32>
    tpu.vector_store %arg6[%c0_11, %c0_12], %15 {strides = array<i32>} : memref<4x512xf32, #tpu.memory_space<vmem>>, vector<4x512xf32>,
    return
  }
  func.func @transform_0(%arg0: i32) -> (i32, i32) {
    %c0_i32 = arith.constant 0 : i32
    %c0_i32_0 = arith.constant 0 : i32
    return %arg0, %c0_i32 : i32, i32
  }
  func.func @transform_1(%arg0: i32) -> (i32, i32) {
    %c0_i32 = arith.constant 0 : i32
    %c0_i32_0 = arith.constant 0 : i32
    %c0_i32_1 = arith.constant 0 : i32
    return %c0_i32, %c0_i32_0 : i32, i32
  }
  func.func @transform_2(%arg0: i32) -> (i32, i32) {
    %c0_i32 = arith.constant 0 : i32
    %c0_i32_0 = arith.constant 0 : i32
    %c0_i32_1 = arith.constant 0 : i32
    return %c0_i32, %c0_i32_0 : i32, i32
  }
  func.func @transform_3(%arg0: i32) -> (i32, i32) {
    %c0_i32 = arith.constant 0 : i32
    %c0_i32_0 = arith.constant 0 : i32
    %c0_i32_1 = arith.constant 0 : i32
    return %c0_i32, %c0_i32_0 : i32, i32
  }
  func.func @transform_4(%arg0: i32) -> (i32, i32) {
    %c0_i32 = arith.constant 0 : i32
    %c0_i32_0 = arith.constant 0 : i32
    %c0_i32_1 = arith.constant 0 : i32
    return %c0_i32, %c0_i32_0 : i32, i32
  }
  func.func @transform_5(%arg0: i32) -> (i32, i32) {
    %c0_i32 = arith.constant 0 : i32
    %c0_i32_0 = arith.constant 0 : i32
    return %arg0, %c0_i32 : i32, i32
  }
}

</mosaic_0001>

<bundles_post_ra>
// kernel: tpu_custom_call.1
= control target key start
LH: loop header
LB: loop body
LE: loop exit
PB: predicated region body
PF: predicated region fallthrough
CT: control target
= control target key end

     0   :  { %10 = vsyncpa [#allocation3], 0  ;;  %s2893_s0 = inlined_call_operand.hbm [shape: f32[4,512], index: 0, kind: input, shape index: {}]   ;;  %s2894_s1 = inlined_call_operand.hbm [shape: bf16[512,512], index: 1, kind: input, shape index: {}]   ;;  %s2895_s2 = inlined_call_operand.hbm [shape: f32[1,512], index: 2, kind: input, shape index: {}]   ;;  %s2896_s3 = inlined_call_operand.hbm [shape: bf16[512,512], index: 3, kind: input, shape index: {}]   ;;  %s2897_s4 = inlined_call_operand.vmem [shape: f32[1,512], index: 4, kind: input, shape index: {}]   ;;  %s2898_s5 = inlined_call_operand.hbm [shape: f32[4,512], index: 5, kind: output, shape index: {}]  }
   0x1   :  { %11 = vsyncpa [#allocation6], 0 }
   0x2   :  { %12 = vsyncpa [#allocation9], 0 }
   0x3   :  { %13 = vsyncpa [#allocation4], 0  ;;  %s2788_s18 = smov [#allocation5]  }
   0x4   :  { %s29_s19 = sshll.u32 %s2788_s18, 4  ;;  %s30_s19 = int_to_ptr.vmem [resolvable:$true] %s29_s19 }
   0x5   :  { %s2688_s20 = scalar_lea.vmem %s30_s19, 16384  ;;  %p2693_p1 = scmp.lt.s32.totalorder %s30_s19, %s30_s19 }
   0x6   :  { %p2689_p0 = scmp.ne.s32.totalorder %s30_s19, %s2688_s20  ;;  %p2694_p2 = scmp.lt.s32.totalorder %s2688_s20, %s2688_s20 }
   0x8   :  { %p2695_p3 = por %p2694_p2, %p2693_p1 }
   0xa   :  { %p2696_p4 = pnand %p2695_p3, %p2689_p0 }
   0xc   :  { %2699 = shalt.err (!%p2696_p4)
}
   0xd   :  { %s2789_s21 = smov 256   ;;  %s2790_s22 = smov 16  }
   0xe   :  { %35 = dma.hbm_to_vmem [thread:$0]  %s2894_s1, 16384, %s30_s19, [#allocation6], %s2789_s21, %s2789_s21, %s2790_s22  }
   0xf   :  { %s2791_s25 = smov [#allocation2]   ;;  %s2792_s27 = smov [#allocation7]  }
  0x10   :  { %s20_s26 = sshll.u32 %s2791_s25, 4  ;;  %s42_s28 = sshll.u32 %s2792_s27, 4  ;;  %s21_s26 = int_to_ptr.vmem [resolvable:$true] %s20_s26  ;;  %s43_s28 = int_to_ptr.vmem [resolvable:$true] %s42_s28 }
  0x11   :  { %s2708_s29 = scalar_lea.vmem %s21_s26, 256  ;;  %p2713_p6 = scmp.lt.s32.totalorder %s21_s26, %s21_s26 }
  0x12   :  { %p2709_p5 = scmp.ne.s32.totalorder %s21_s26, %s2708_s29  ;;  %p2714_p7 = scmp.lt.s32.totalorder %s2708_s29, %s2708_s29 }
  0x14   :  { %p2715_p8 = por %p2714_p7, %p2713_p6 }
  0x16   :  { %p2716_p9 = pnand %p2715_p8, %p2709_p5 }
  0x18   :  { %2719 = shalt.err (!%p2716_p9)
}
  0x19   :  { %23 = dma.hbm_to_vmem [thread:$0]  %s2893_s0, 256, %s21_s26, [#allocation3]  }
  0x1a   :  { %s2728_s7 = scalar_lea.vmem %s43_s28, 64  ;;  %p2733_p11 = scmp.lt.s32.totalorder %s43_s28, %s43_s28 }
  0x1b   :  { %p2729_p10 = scmp.ne.s32.totalorder %s43_s28, %s2728_s7  ;;  %p2734_p12 = scmp.lt.s32.totalorder %s2728_s7, %s2728_s7 }
  0x1d   :  { %p2735_p13 = por %p2734_p12, %p2733_p11 }
  0x1f   :  { %p2736_p0 = pnand %p2735_p13, %p2729_p10 }
  0x21   :  { %2739 = shalt.err (!%p2736_p0)
}
  0x22   :  { %45 = dma.hbm_to_vmem [thread:$0]  %s2895_s2, 64, %s43_s28, [#allocation6]  }
  0x23   :  { %s2793_s9 = smov [#allocation8]  }
  0x24   :  { %s51_s10 = sshll.u32 %s2793_s9, 4  ;;  %s52_s10 = int_to_ptr.vmem [resolvable:$true] %s51_s10 }
  0x25   :  { %s2748_s11 = scalar_lea.vmem %s52_s10, 16384  ;;  %p2753_p2 = scmp.lt.s32.totalorder %s52_s10, %s52_s10 }
  0x26   :  { %p2749_p1 = scmp.ne.s32.totalorder %s52_s10, %s2748_s11  ;;  %p2754_p3 = scmp.lt.s32.totalorder %s2748_s11, %s2748_s11 }
  0x28   :  { %p2755_p4 = por %p2754_p3, %p2753_p2 }
  0x2a   :  { %p2756_p5 = pnand %p2755_p4, %p2749_p1 }
  0x2c   :  { %2759 = shalt.err (!%p2756_p5)
}
  0x2d   :  { %57 = dma.hbm_to_vmem [thread:$0]  %s2896_s3, 16384, %s52_s10, [#allocation9], %s2789_s21, %s2789_s21, %s2790_s22  }
  0x2e   :  { %2780 = dma.done.wait [#allocation3], 256  }
  0x2f   :  { %2781 = vsyncadd [#allocation3], 4294967040 }
  0x30   :  { %2782 = dma.done.wait [#allocation6], 16448  }
  0x31   :  { %2783 = vsyncadd [#allocation6], 4294950848 }
  0x32   :  { %2784 = dma.done.wait [#allocation9], 16384  }
  0x33   :  { %2785 = vsyncadd [#allocation9], 4294950912  ;;  %v2294_v0 = vld [vmem:[#allocation5 + $0xe4] ss:$16 sps:$4 sm:$0xff]   ;;  %v2298_v2 = vld [vmem:[#allocation5 + $0xe0] ss:$16 sps:$4 sm:$0xff]  }
  0x34   :  { %v2296_v1 = vld [vmem:[#allocation5 + $0x2e4] ss:$16 sps:$4 sm:$0xff]   ;;  %874 = vmatprep.subr.bf16.mxu0 %v2294_v0  ;;  %v2299_v3 = vld [vmem:[#allocation5 + $0x2e0] ss:$16 sps:$4 sm:$0xff]   ;;  %v73_v48 = vld [vmem:[#allocation2 + $0x8] sm:$0xff] }
  0x35   :  { %915 = vmatprep.subr.bf16.mxu1 %v2296_v1  ;;  %v2300_v4 = vld [vmem:[#allocation5 + $0xc4] ss:$16 sps:$4 sm:$0xff]   ;;  %875 = vmatpush1.bf16.msra.mxu0 %v2298_v2  ;;  %v2304_v6 = vld [vmem:[#allocation5 + $0xc0] ss:$16 sps:$4 sm:$0xff]   ;;  %v77_v51 = vcombine.high %v73_v48, %v73_v48 }
  0x36   :  { %916 = vmatpush1.bf16.msra.mxu1 %v2299_v3  ;;  %v2302_v5 = vld [vmem:[#allocation5 + $0x2c4] ss:$16 sps:$4 sm:$0xff]   ;;  %876 = vmatprep.subr.bf16.mxu0 %v2300_v4  ;;  %v2305_v7 = vld [vmem:[#allocation5 + $0x2c0] ss:$16 sps:$4 sm:$0xff]  }
  0x37   :  { %917 = vmatprep.subr.bf16.mxu1 %v2302_v5  ;;  %v2306_v8 = vld [vmem:[#allocation5 + $0xa4] ss:$16 sps:$4 sm:$0xff]   ;;  %v2310_v10 = vld [vmem:[#allocation5 + $0xa0] ss:$16 sps:$4 sm:$0xff]   ;;  %v83_v55 = vpack.c.bf16 %v77_v51, %v77_v51  ;;  %v2455_v51 = vld [vmem:[#allocation5 + $0x3a8] ss:$16 sps:$4 sm:$0xff]  }
  0x38   :  { %v2308_v9 = vld [vmem:[#allocation5 + $0x2a4] ss:$16 sps:$4 sm:$0xff]   ;;  %v2311_v11 = vld [vmem:[#allocation5 + $0x2a0] ss:$16 sps:$4 sm:$0xff]  }
  0x39   :  { %877 = vmatpush1.bf16.msra.mxu0 %v2304_v6  ;;  %v2312_v12 = vld [vmem:[#allocation5 + $0x84] ss:$16 sps:$4 sm:$0xff]   ;;  %v2316_v14 = vld [vmem:[#allocation5 + $0x80] ss:$16 sps:$4 sm:$0xff]   ;;  %947 = vmatprep.mubr.bf16.mxu1 %v83_v55  ;;  %v2394_v6 = vld [vmem:[#allocation5 + $0xec] ss:$16 sps:$4 sm:$0xff]  }
  0x3a   :  { %918 = vmatpush1.bf16.msra.mxu1 %v2305_v7  ;;  %878 = vmatprep.subr.bf16.mxu0 %v2306_v8  ;;  %v2314_v13 = vld [vmem:[#allocation5 + $0x284] ss:$16 sps:$4 sm:$0xff]   ;;  %v2317_v15 = vld [vmem:[#allocation5 + $0x280] ss:$16 sps:$4 sm:$0xff]   ;;  %v2397_v7 = vld [vmem:[#allocation5 + $0x2ec] ss:$16 sps:$4 sm:$0xff]  }
  0x3b   :  { %919 = vmatprep.subr.bf16.mxu1 %v2308_v9  ;;  %v2318_v16 = vld [vmem:[#allocation5 + $0x64] ss:$16 sps:$4 sm:$0xff]   ;;  %v2322_v18 = vld [vmem:[#allocation5 + $0x60] ss:$16 sps:$4 sm:$0xff]   ;;  %v2845_v9 = vpack.c.bf16 %v73_v48, %v73_v48  ;;  %v2454_v48 = vld [vmem:[#allocation5 + $0x1ac] ss:$16 sps:$4 sm:$0xff]  }
  0x3c   :  { %v2320_v17 = vld [vmem:[#allocation5 + $0x264] ss:$16 sps:$4 sm:$0xff]   ;;  %v2323_v19 = vld [vmem:[#allocation5 + $0x260] ss:$16 sps:$4 sm:$0xff]  }
  0x3d   :  { %879 = vmatpush1.bf16.msra.mxu0 %v2310_v10  ;;  %v2324_v20 = vld [vmem:[#allocation5 + $0x44] ss:$16 sps:$4 sm:$0xff]   ;;  %v2328_v22 = vld [vmem:[#allocation5 + $0x40] ss:$16 sps:$4 sm:$0xff]   ;;  %v2392_v10 = vld [vmem:[#allocation5 + $0xe8] ss:$16 sps:$4 sm:$0xff]  }
  0x3e   :  { %920 = vmatpush1.bf16.msra.mxu1 %v2311_v11  ;;  %880 = vmatprep.subr.bf16.mxu0 %v2312_v12  ;;  %v2326_v21 = vld [vmem:[#allocation5 + $0x244] ss:$16 sps:$4 sm:$0xff]   ;;  %v2329_v23 = vld [vmem:[#allocation5 + $0x240] ss:$16 sps:$4 sm:$0xff]   ;;  %v2395_v11 = vld [vmem:[#allocation5 + $0x2e8] ss:$16 sps:$4 sm:$0xff]  }
  0x3f   :  { %921 = vmatprep.subr.bf16.mxu1 %v2314_v13  ;;  %v2330_v24 = vld [vmem:[#allocation5 + $0x24] ss:$16 sps:$4 sm:$0xff]   ;;  %v2334_v26 = vld [vmem:[#allocation5 + $0x20] ss:$16 sps:$4 sm:$0xff]   ;;  %v2400_v12 = vld [vmem:[#allocation5 + $0xcc] ss:$16 sps:$4 sm:$0xff]  }
  0x40   :  { %v2332_v25 = vld [vmem:[#allocation5 + $0x224] ss:$16 sps:$4 sm:$0xff]   ;;  %v2335_v27 = vld [vmem:[#allocation5 + $0x220] ss:$16 sps:$4 sm:$0xff]   ;;  %v2403_v13 = vld [vmem:[#allocation5 + $0x2cc] ss:$16 sps:$4 sm:$0xff]  }
  0x41   :  { %881 = vmatpush1.bf16.msra.mxu0 %v2316_v14  ;;  %v2336_v28 = vld [vmem:[#allocation5 + $0x4] ss:$16 sps:$4 sm:$0xff]   ;;  %v2340_v30 = vld [vmem:[#allocation5] ss:$16 sps:$4 sm:$0xff]   ;;  %v2398_v14 = vld [vmem:[#allocation5 + $0xc8] ss:$16 sps:$4 sm:$0xff]  }
  0x42   :  { %922 = vmatpush1.bf16.msra.mxu1 %v2317_v15  ;;  %882 = vmatprep.subr.bf16.mxu0 %v2318_v16  ;;  %v2338_v29 = vld [vmem:[#allocation5 + $0x204] ss:$16 sps:$4 sm:$0xff]   ;;  %v2341_v31 = vld [vmem:[#allocation5 + $0x200] ss:$16 sps:$4 sm:$0xff]   ;;  %v2401_v15 = vld [vmem:[#allocation5 + $0x2c8] ss:$16 sps:$4 sm:$0xff]  }
  0x43   :  { %923 = vmatprep.subr.bf16.mxu1 %v2320_v17  ;;  %v2342_v32 = vld [vmem:[#allocation5 + $0x1e4] ss:$16 sps:$4 sm:$0xff]   ;;  %v2346_v34 = vld [vmem:[#allocation5 + $0x1e0] ss:$16 sps:$4 sm:$0xff]   ;;  %v2406_v16 = vld [vmem:[#allocation5 + $0xac] ss:$16 sps:$4 sm:$0xff]  }
  0x44   :  { %v2344_v33 = vld [vmem:[#allocation5 + $0x3e4] ss:$16 sps:$4 sm:$0xff]   ;;  %v2347_v35 = vld [vmem:[#allocation5 + $0x3e0] ss:$16 sps:$4 sm:$0xff]   ;;  %v2409_v17 = vld [vmem:[#allocation5 + $0x2ac] ss:$16 sps:$4 sm:$0xff]  }
  0x45   :  { %883 = vmatpush1.bf16.msra.mxu0 %v2322_v18  ;;  %v2348_v36 = vld [vmem:[#allocation5 + $0x1c4] ss:$16 sps:$4 sm:$0xff]   ;;  %v2352_v38 = vld [vmem:[#allocation5 + $0x1c0] ss:$16 sps:$4 sm:$0xff]   ;;  %v2404_v18 = vld [vmem:[#allocation5 + $0xa8] ss:$16 sps:$4 sm:$0xff]  }
  0x46   :  { %924 = vmatpush1.bf16.msra.mxu1 %v2323_v19  ;;  %884 = vmatprep.subr.bf16.mxu0 %v2324_v20  ;;  %v2350_v37 = vld [vmem:[#allocation5 + $0x3c4] ss:$16 sps:$4 sm:$0xff]   ;;  %v2353_v39 = vld [vmem:[#allocation5 + $0x3c0] ss:$16 sps:$4 sm:$0xff]   ;;  %v2407_v19 = vld [vmem:[#allocation5 + $0x2a8] ss:$16 sps:$4 sm:$0xff]  }
  0x47   :  { %925 = vmatprep.subr.bf16.mxu1 %v2326_v21  ;;  %v2354_v40 = vld [vmem:[#allocation5 + $0x1a4] ss:$16 sps:$4 sm:$0xff]   ;;  %v2358_v42 = vld [vmem:[#allocation5 + $0x1a0] ss:$16 sps:$4 sm:$0xff]   ;;  %v2412_v20 = vld [vmem:[#allocation5 + $0x8c] ss:$16 sps:$4 sm:$0xff]  }
  0x48   :  { %v2356_v41 = vld [vmem:[#allocation5 + $0x3a4] ss:$16 sps:$4 sm:$0xff]   ;;  %v2359_v43 = vld [vmem:[#allocation5 + $0x3a0] ss:$16 sps:$4 sm:$0xff]   ;;  %v2415_v21 = vld [vmem:[#allocation5 + $0x28c] ss:$16 sps:$4 sm:$0xff]  }
  0x49   :  { %885 = vmatpush1.bf16.msra.mxu0 %v2328_v22  ;;  %v2360_v44 = vld [vmem:[#allocation5 + $0x184] ss:$16 sps:$4 sm:$0xff]   ;;  %v2364_v49 = vld [vmem:[#allocation5 + $0x180] ss:$16 sps:$4 sm:$0xff]   ;;  %v2410_v22 = vld [vmem:[#allocation5 + $0x88] ss:$16 sps:$4 sm:$0xff]  }
  0x4a   :  { %926 = vmatpush1.bf16.msra.mxu1 %v2329_v23  ;;  %886 = vmatprep.subr.bf16.mxu0 %v2330_v24  ;;  %v2362_v45 = vld [vmem:[#allocation5 + $0x384] ss:$16 sps:$4 sm:$0xff]   ;;  %v2365_v50 = vld [vmem:[#allocation5 + $0x380] ss:$16 sps:$4 sm:$0xff]   ;;  %v2413_v23 = vld [vmem:[#allocation5 + $0x288] ss:$16 sps:$4 sm:$0xff]  }
  0x4b   :  { %927 = vmatprep.subr.bf16.mxu1 %v2332_v25  ;;  %v72_v46 = vld [vmem:[#allocation2] sm:$0xff]  ;;  %v2418_v24 = vld [vmem:[#allocation5 + $0x6c] ss:$16 sps:$4 sm:$0xff]  }
  0x4c   :  { %v76_v47 = vcombine.high %v72_v46, %v72_v46  ;;  %v2366_v52 = vld [vmem:[#allocation5 + $0x164] ss:$16 sps:$4 sm:$0xff]   ;;  %v2370_v56 = vld [vmem:[#allocation5 + $0x160] ss:$16 sps:$4 sm:$0xff]   ;;  %v2843_v8 = vpack.c.bf16 %v72_v46, %v72_v46  ;;  %v2421_v25 = vld [vmem:[#allocation5 + $0x26c] ss:$16 sps:$4 sm:$0xff]  }
  0x4d   :  { %887 = vmatpush1.bf16.msra.mxu0 %v2334_v26  ;;  %v2368_v53 = vld [vmem:[#allocation5 + $0x364] ss:$16 sps:$4 sm:$0xff]   ;;  %v2371_v57 = vld [vmem:[#allocation5 + $0x360] ss:$16 sps:$4 sm:$0xff]   ;;  %v2416_v26 = vld [vmem:[#allocation5 + $0x68] ss:$16 sps:$4 sm:$0xff]  }
  0x4e   :  { %928 = vmatpush1.bf16.msra.mxu1 %v2335_v27  ;;  %888 = vmatprep.subr.bf16.mxu0 %v2336_v28  ;;  %v81_v54 = vpack.c.bf16 %v76_v47, %v76_v47  ;;  %v2372_v58 = vld [vmem:[#allocation5 + $0x144] ss:$16 sps:$4 sm:$0xff]   ;;  %v2376_v60 = vld [vmem:[#allocation5 + $0x140] ss:$16 sps:$4 sm:$0xff]   ;;  %v2419_v27 = vld [vmem:[#allocation5 + $0x268] ss:$16 sps:$4 sm:$0xff]  }
  0x4f   :  { %929 = vmatprep.subr.bf16.mxu1 %v2338_v29  ;;  %v2374_v59 = vld [vmem:[#allocation5 + $0x344] ss:$16 sps:$4 sm:$0xff]   ;;  %v2377_v61 = vld [vmem:[#allocation5 + $0x340] ss:$16 sps:$4 sm:$0xff]   ;;  %v2424_v28 = vld [vmem:[#allocation5 + $0x4c] ss:$16 sps:$4 sm:$0xff]  }
  0x50   :  { %906 = vmatprep.mubr.bf16.mxu0 %v81_v54  ;;  %v2378_v62 = vld [vmem:[#allocation5 + $0x124] ss:$16 sps:$4 sm:$0xff]   ;;  %v2382_v0 = vld [vmem:[#allocation5 + $0x120] ss:$16 sps:$4 sm:$0xff]   ;;  %v2427_v29 = vld [vmem:[#allocation5 + $0x24c] ss:$16 sps:$4 sm:$0xff]  }
  0x51   :  { %889 = vmatpush1.bf16.msra.mxu0 %v2340_v30  ;;  %v2380_v63 = vld [vmem:[#allocation5 + $0x324] ss:$16 sps:$4 sm:$0xff]   ;;  %v2383_v1 = vld [vmem:[#allocation5 + $0x320] ss:$16 sps:$4 sm:$0xff]   ;;  %v2422_v30 = vld [vmem:[#allocation5 + $0x48] ss:$16 sps:$4 sm:$0xff]  }
  0x52   :  { %930 = vmatpush1.bf16.msra.mxu1 %v2341_v31  ;;  %890 = vmatprep.subr.bf16.mxu0 %v2342_v32  ;;  %v2384_v2 = vld [vmem:[#allocation5 + $0x104] ss:$16 sps:$4 sm:$0xff]   ;;  %v2388_v4 = vld [vmem:[#allocation5 + $0x100] ss:$16 sps:$4 sm:$0xff]   ;;  %v2425_v31 = vld [vmem:[#allocation5 + $0x248] ss:$16 sps:$4 sm:$0xff]  }
  0x53   :  { %931 = vmatprep.subr.bf16.mxu1 %v2344_v33  ;;  %v2386_v3 = vld [vmem:[#allocation5 + $0x304] ss:$16 sps:$4 sm:$0xff]   ;;  %v2389_v5 = vld [vmem:[#allocation5 + $0x300] ss:$16 sps:$4 sm:$0xff]   ;;  %v2430_v32 = vld [vmem:[#allocation5 + $0x2c] ss:$16 sps:$4 sm:$0xff]  }
  0x54   :  { %v2433_v33 = vld [vmem:[#allocation5 + $0x22c] ss:$16 sps:$4 sm:$0xff]   ;;  %v2446_v46 = vld [vmem:[#allocation5 + $0x1c8] ss:$16 sps:$4 sm:$0xff]  }
  0x55   :  { %891 = vmatpush2.bf16.msra.mxu0 %v2346_v34  ;;  %v2428_v34 = vld [vmem:[#allocation5 + $0x28] ss:$16 sps:$4 sm:$0xff]  }
  0x56   :  { %932 = vmatpush2.bf16.msra.mxu1 %v2347_v35  ;;  %892 = vmatprep.subr.bf16.mxu0 %v2348_v36  ;;  %v2431_v35 = vld [vmem:[#allocation5 + $0x228] ss:$16 sps:$4 sm:$0xff]   ;;  %v2436_v36 = vld [vmem:[#allocation5 + $0xc] ss:$16 sps:$4 sm:$0xff]  }
  0x57   :  { %933 = vmatprep.subr.bf16.mxu1 %v2350_v37  ;;  %v2439_v37 = vld [vmem:[#allocation5 + $0x20c] ss:$16 sps:$4 sm:$0xff]   ;;  %v2449_v47 = vld [vmem:[#allocation5 + $0x3c8] ss:$16 sps:$4 sm:$0xff]  }
  0x59   :  { %893 = vmatpush2.bf16.msra.mxu0 %v2352_v38  ;;  %v2434_v38 = vld [vmem:[#allocation5 + $0x8] ss:$16 sps:$4 sm:$0xff]  }
  0x5a   :  { %934 = vmatpush2.bf16.msra.mxu1 %v2353_v39  ;;  %894 = vmatprep.subr.bf16.mxu0 %v2354_v40  ;;  %v2437_v39 = vld [vmem:[#allocation5 + $0x208] ss:$16 sps:$4 sm:$0xff]   ;;  %v2442_v40 = vld [vmem:[#allocation5 + $0x1ec] ss:$16 sps:$4 sm:$0xff]  }
  0x5b   :  { %935 = vmatprep.subr.bf16.mxu1 %v2356_v41  ;;  %v2445_v41 = vld [vmem:[#allocation5 + $0x3ec] ss:$16 sps:$4 sm:$0xff]  }
  0x5d   :  { %895 = vmatpush2.bf16.msra.mxu0 %v2358_v42  ;;  %v2440_v42 = vld [vmem:[#allocation5 + $0x1e8] ss:$16 sps:$4 sm:$0xff]  }
  0x5e   :  { %936 = vmatpush2.bf16.msra.mxu1 %v2359_v43  ;;  %896 = vmatprep.subr.bf16.mxu0 %v2360_v44  ;;  %v2443_v43 = vld [vmem:[#allocation5 + $0x3e8] ss:$16 sps:$4 sm:$0xff]   ;;  %v2448_v44 = vld [vmem:[#allocation5 + $0x1cc] ss:$16 sps:$4 sm:$0xff]  }
  0x5f   :  { %937 = vmatprep.subr.bf16.mxu1 %v2362_v45  ;;  %v2451_v45 = vld [vmem:[#allocation5 + $0x3cc] ss:$16 sps:$4 sm:$0xff]  }
  0x61   :  { %897 = vmatpush2.bf16.msra.mxu0 %v2364_v49  ;;  %v2457_v49 = vld [vmem:[#allocation5 + $0x3ac] ss:$16 sps:$4 sm:$0xff]  }
  0x62   :  { %938 = vmatpush2.bf16.msra.mxu1 %v2365_v50  ;;  %898 = vmatprep.subr.bf16.mxu0 %v2366_v52  ;;  %v2452_v50 = vld [vmem:[#allocation5 + $0x1a8] ss:$16 sps:$4 sm:$0xff]   ;;  %v2460_v52 = vld [vmem:[#allocation5 + $0x18c] ss:$16 sps:$4 sm:$0xff]  }
  0x63   :  { %939 = vmatprep.subr.bf16.mxu1 %v2368_v53  ;;  %v2463_v53 = vld [vmem:[#allocation5 + $0x38c] ss:$16 sps:$4 sm:$0xff]  }
  0x65   :  { %899 = vmatpush2.bf16.msra.mxu0 %v2370_v56  ;;  %v2466_v56 = vld [vmem:[#allocation5 + $0x16c] ss:$16 sps:$4 sm:$0xff]  }
  0x66   :  { %940 = vmatpush2.bf16.msra.mxu1 %v2371_v57  ;;  %900 = vmatprep.subr.bf16.mxu0 %v2372_v58  ;;  %v2469_v57 = vld [vmem:[#allocation5 + $0x36c] ss:$16 sps:$4 sm:$0xff]   ;;  %v2464_v58 = vld [vmem:[#allocation5 + $0x168] ss:$16 sps:$4 sm:$0xff]  }
  0x67   :  { %941 = vmatprep.subr.bf16.mxu1 %v2374_v59  ;;  %v2467_v59 = vld [vmem:[#allocation5 + $0x368] ss:$16 sps:$4 sm:$0xff]  }
  0x69   :  { %901 = vmatpush2.bf16.msra.mxu0 %v2376_v60  ;;  %v2472_v60 = vld [vmem:[#allocation5 + $0x14c] ss:$16 sps:$4 sm:$0xff]  }
  0x6a   :  { %942 = vmatpush2.bf16.msra.mxu1 %v2377_v61  ;;  %902 = vmatprep.subr.bf16.mxu0 %v2378_v62  ;;  %v2475_v61 = vld [vmem:[#allocation5 + $0x34c] ss:$16 sps:$4 sm:$0xff]   ;;  %v2470_v62 = vld [vmem:[#allocation5 + $0x148] ss:$16 sps:$4 sm:$0xff]  }
  0x6b   :  { %943 = vmatprep.subr.bf16.mxu1 %v2380_v63  ;;  %v2473_v63 = vld [vmem:[#allocation5 + $0x348] ss:$16 sps:$4 sm:$0xff]  }
  0x6d   :  { %903 = vmatpush2.bf16.msra.mxu0 %v2382_v0  ;;  %v2478_v0 = vld [vmem:[#allocation5 + $0x12c] ss:$16 sps:$4 sm:$0xff]  }
  0x6e   :  { %944 = vmatpush2.bf16.msra.mxu1 %v2383_v1  ;;  %904 = vmatprep.subr.bf16.mxu0 %v2384_v2  ;;  %v2481_v1 = vld [vmem:[#allocation5 + $0x32c] ss:$16 sps:$4 sm:$0xff]   ;;  %v2476_v2 = vld [vmem:[#allocation5 + $0x128] ss:$16 sps:$4 sm:$0xff]  }
  0x6f   :  { %945 = vmatprep.subr.bf16.mxu1 %v2386_v3  ;;  %v2479_v3 = vld [vmem:[#allocation5 + $0x328] ss:$16 sps:$4 sm:$0xff]  }
  0x71   :  { %905 = vmatpush2.bf16.msra.mxu0 %v2388_v4  ;;  %v2484_v4 = vld [vmem:[#allocation5 + $0x10c] ss:$16 sps:$4 sm:$0xff]  }
  0x72   :  { %946 = vmatpush2.bf16.msra.mxu1 %v2389_v5  ;;  %956 = vmatprep.subr.bf16.mxu0 %v2394_v6  ;;  %v2487_v5 = vld [vmem:[#allocation5 + $0x30c] ss:$16 sps:$4 sm:$0xff]   ;;  %v2482_v6 = vld [vmem:[#allocation5 + $0x108] ss:$16 sps:$4 sm:$0xff]  }
  0x73   :  { %997 = vmatprep.subr.bf16.mxu1 %v2397_v7  ;;  %v2485_v7 = vld [vmem:[#allocation5 + $0x308] ss:$16 sps:$4 sm:$0xff]  }
  0x74   :  { %907 = vmatmul.mubr.bf16.vlgmr.msra.gmra.mxu0 %v2843_v8 }
  0x75   :  { %948 = vmatmul.mubr.bf16.vlgmr.msra.gmra.mxu1 %v2845_v9  ;;  %957 = vmatpush1.bf16.msra.mxu0 %v2392_v10  ;;  %v2490_v10 = vld [vmem:[#allocation8 + $0xe4] ss:$16 sps:$4 sm:$0xff]  }
  0x76   :  { %998 = vmatpush1.bf16.msra.mxu1 %v2395_v11  ;;  %958 = vmatprep.subr.bf16.mxu0 %v2400_v12  ;;  %v2488_v11 = vld [vmem:[#allocation8 + $0xe0] ss:$16 sps:$4 sm:$0xff]   ;;  %v2493_v12 = vld [vmem:[#allocation8 + $0xc4] ss:$16 sps:$4 sm:$0xff]  }
  0x77   :  { %999 = vmatprep.subr.bf16.mxu1 %v2403_v13  ;;  %988 = vmatprep.mubr.bf16.mxu0 %v81_v54  ;;  %v2458_v54 = vld [vmem:[#allocation5 + $0x188] ss:$16 sps:$4 sm:$0xff]   ;;  %v2491_v13 = vld [vmem:[#allocation8 + $0xc0] ss:$16 sps:$4 sm:$0xff]  }
  0x78   :  { %1029 = vmatprep.mubr.bf16.mxu1 %v83_v55  ;;  %v2461_v55 = vld [vmem:[#allocation5 + $0x388] ss:$16 sps:$4 sm:$0xff]  }
  0x79   :  { %959 = vmatpush1.bf16.msra.mxu0 %v2398_v14  ;;  %v2496_v14 = vld [vmem:[#allocation8 + $0xa4] ss:$16 sps:$4 sm:$0xff]  }
  0x7a   :  { %1000 = vmatpush1.bf16.msra.mxu1 %v2401_v15  ;;  %960 = vmatprep.subr.bf16.mxu0 %v2406_v16  ;;  %v2494_v15 = vld [vmem:[#allocation8 + $0xa0] ss:$16 sps:$4 sm:$0xff]   ;;  %v2499_v16 = vld [vmem:[#allocation8 + $0x84] ss:$16 sps:$4 sm:$0xff]  }
  0x7b   :  { %1001 = vmatprep.subr.bf16.mxu1 %v2409_v17  ;;  %v2497_v17 = vld [vmem:[#allocation8 + $0x80] ss:$16 sps:$4 sm:$0xff]  }
  0x7d   :  { %961 = vmatpush1.bf16.msra.mxu0 %v2404_v18  ;;  %v2502_v18 = vld [vmem:[#allocation8 + $0x64] ss:$16 sps:$4 sm:$0xff]  }
  0x7e   :  { %1002 = vmatpush1.bf16.msra.mxu1 %v2407_v19  ;;  %962 = vmatprep.subr.bf16.mxu0 %v2412_v20  ;;  %v2538_v19 = vld [vmem:[#allocation8 + $0x2e4] ss:$16 sps:$4 sm:$0xff]   ;;  %v2536_v20 = vld [vmem:[#allocation8 + $0x2e0] ss:$16 sps:$4 sm:$0xff]  }
  0x7f   :  { %1003 = vmatprep.subr.bf16.mxu1 %v2415_v21  ;;  %v2500_v21 = vld [vmem:[#allocation8 + $0x60] ss:$16 sps:$4 sm:$0xff]  }
  0x81   :  { %963 = vmatpush1.bf16.msra.mxu0 %v2410_v22  ;;  %v2544_v22 = vld [vmem:[#allocation8 + $0x2c4] ss:$16 sps:$4 sm:$0xff]  }
  0x82   :  { %1004 = vmatpush1.bf16.msra.mxu1 %v2413_v23  ;;  %964 = vmatprep.subr.bf16.mxu0 %v2418_v24  ;;  %v2503_v23 = vld [vmem:[#allocation8 + $0x40] ss:$16 sps:$4 sm:$0xff]   ;;  %v2508_v24 = vld [vmem:[#allocation8 + $0x24] ss:$16 sps:$4 sm:$0xff]  }
  0x83   :  { %1005 = vmatprep.subr.bf16.mxu1 %v2421_v25  ;;  %v2548_v25 = vld [vmem:[#allocation8 + $0x2a0] ss:$16 sps:$4 sm:$0xff]  }
  0x85   :  { %965 = vmatpush1.bf16.msra.mxu0 %v2416_v26  ;;  %v2550_v26 = vld [vmem:[#allocation8 + $0x2a4] ss:$16 sps:$4 sm:$0xff]  }
  0x86   :  { %1006 = vmatpush1.bf16.msra.mxu1 %v2419_v27  ;;  %966 = vmatprep.subr.bf16.mxu0 %v2424_v28  ;;  %v2506_v27 = vld [vmem:[#allocation8 + $0x20] ss:$16 sps:$4 sm:$0xff]   ;;  %v2511_v28 = vld [vmem:[#allocation8 + $0x4] ss:$16 sps:$4 sm:$0xff]  }
  0x87   :  { %1007 = vmatprep.subr.bf16.mxu1 %v2427_v29  ;;  %v2554_v29 = vld [vmem:[#allocation8 + $0x280] ss:$16 sps:$4 sm:$0xff]  }
  0x89   :  { %967 = vmatpush1.bf16.msra.mxu0 %v2422_v30  ;;  %v2556_v30 = vld [vmem:[#allocation8 + $0x284] ss:$16 sps:$4 sm:$0xff]  }
  0x8a   :  { %1008 = vmatpush1.bf16.msra.mxu1 %v2425_v31  ;;  %968 = vmatprep.subr.bf16.mxu0 %v2430_v32  ;;  %v2509_v31 = vld [vmem:[#allocation8] ss:$16 sps:$4 sm:$0xff]   ;;  %v2514_v32 = vld [vmem:[#allocation8 + $0x1e4] ss:$16 sps:$4 sm:$0xff]  }
  0x8b   :  { %1009 = vmatprep.subr.bf16.mxu1 %v2433_v33  ;;  %v2560_v33 = vld [vmem:[#allocation8 + $0x260] ss:$16 sps:$4 sm:$0xff]  }
  0x8d   :  { %969 = vmatpush1.bf16.msra.mxu0 %v2428_v34  ;;  %v2562_v34 = vld [vmem:[#allocation8 + $0x264] ss:$16 sps:$4 sm:$0xff]  }
  0x8e   :  { %1010 = vmatpush1.bf16.msra.mxu1 %v2431_v35  ;;  %970 = vmatprep.subr.bf16.mxu0 %v2436_v36  ;;  %v2512_v35 = vld [vmem:[#allocation8 + $0x1e0] ss:$16 sps:$4 sm:$0xff]   ;;  %v2517_v36 = vld [vmem:[#allocation8 + $0x1c4] ss:$16 sps:$4 sm:$0xff]  }
  0x8f   :  { %1011 = vmatprep.subr.bf16.mxu1 %v2439_v37  ;;  %v2566_v37 = vld [vmem:[#allocation8 + $0x240] ss:$16 sps:$4 sm:$0xff]  }
  0x91   :  { %971 = vmatpush1.bf16.msra.mxu0 %v2434_v38  ;;  %v2568_v38 = vld [vmem:[#allocation8 + $0x244] ss:$16 sps:$4 sm:$0xff]  }
  0x92   :  { %1012 = vmatpush1.bf16.msra.mxu1 %v2437_v39  ;;  %972 = vmatprep.subr.bf16.mxu0 %v2442_v40  ;;  %v2515_v39 = vld [vmem:[#allocation8 + $0x1c0] ss:$16 sps:$4 sm:$0xff]   ;;  %v2520_v40 = vld [vmem:[#allocation8 + $0x1a4] ss:$16 sps:$4 sm:$0xff]  }
  0x93   :  { %1013 = vmatprep.subr.bf16.mxu1 %v2445_v41  ;;  %v2572_v41 = vld [vmem:[#allocation8 + $0x220] ss:$16 sps:$4 sm:$0xff]  }
  0x95   :  { %973 = vmatpush2.bf16.msra.mxu0 %v2440_v42  ;;  %v2574_v42 = vld [vmem:[#allocation8 + $0x224] ss:$16 sps:$4 sm:$0xff]  }
  0x96   :  { %1014 = vmatpush2.bf16.msra.mxu1 %v2443_v43  ;;  %974 = vmatprep.subr.bf16.mxu0 %v2448_v44  ;;  %v2518_v43 = vld [vmem:[#allocation8 + $0x1a0] ss:$16 sps:$4 sm:$0xff]   ;;  %v2523_v44 = vld [vmem:[#allocation8 + $0x184] ss:$16 sps:$4 sm:$0xff]  }
  0x97   :  { %1015 = vmatprep.subr.bf16.mxu1 %v2451_v45  ;;  %v2578_v45 = vld [vmem:[#allocation8 + $0x200] ss:$16 sps:$4 sm:$0xff]  }
  0x99   :  { %975 = vmatpush2.bf16.msra.mxu0 %v2446_v46  ;;  %v2580_v46 = vld [vmem:[#allocation8 + $0x204] ss:$16 sps:$4 sm:$0xff]  }
  0x9a   :  { %1016 = vmatpush2.bf16.msra.mxu1 %v2449_v47  ;;  %976 = vmatprep.subr.bf16.mxu0 %v2454_v48  ;;  %v2521_v47 = vld [vmem:[#allocation8 + $0x180] ss:$16 sps:$4 sm:$0xff]   ;;  %v2526_v48 = vld [vmem:[#allocation8 + $0x164] ss:$16 sps:$4 sm:$0xff]  }
  0x9b   :  { %1017 = vmatprep.subr.bf16.mxu1 %v2457_v49  ;;  %v2584_v49 = vld [vmem:[#allocation8 + $0x3e0] ss:$16 sps:$4 sm:$0xff]  }
  0x9d   :  { %977 = vmatpush2.bf16.msra.mxu0 %v2452_v50  ;;  %v2586_v50 = vld [vmem:[#allocation8 + $0x3e4] ss:$16 sps:$4 sm:$0xff]  }
  0x9e   :  { %1018 = vmatpush2.bf16.msra.mxu1 %v2455_v51  ;;  %978 = vmatprep.subr.bf16.mxu0 %v2460_v52  ;;  %v2524_v51 = vld [vmem:[#allocation8 + $0x160] ss:$16 sps:$4 sm:$0xff]   ;;  %v2529_v52 = vld [vmem:[#allocation8 + $0x144] ss:$16 sps:$4 sm:$0xff]  }
  0x9f   :  { %1019 = vmatprep.subr.bf16.mxu1 %v2463_v53  ;;  %v2590_v53 = vld [vmem:[#allocation8 + $0x3c0] ss:$16 sps:$4 sm:$0xff]  }
  0xa1   :  { %979 = vmatpush2.bf16.msra.mxu0 %v2458_v54  ;;  %v2592_v54 = vld [vmem:[#allocation8 + $0x3c4] ss:$16 sps:$4 sm:$0xff]  }
  0xa2   :  { %1020 = vmatpush2.bf16.msra.mxu1 %v2461_v55  ;;  %980 = vmatprep.subr.bf16.mxu0 %v2466_v56  ;;  %v2527_v55 = vld [vmem:[#allocation8 + $0x140] ss:$16 sps:$4 sm:$0xff]   ;;  %v2532_v56 = vld [vmem:[#allocation8 + $0x124] ss:$16 sps:$4 sm:$0xff]  }
  0xa3   :  { %1021 = vmatprep.subr.bf16.mxu1 %v2469_v57  ;;  %v2596_v57 = vld [vmem:[#allocation8 + $0x3a0] ss:$16 sps:$4 sm:$0xff]  }
  0xa5   :  { %981 = vmatpush2.bf16.msra.mxu0 %v2464_v58  ;;  %v2598_v58 = vld [vmem:[#allocation8 + $0x3a4] ss:$16 sps:$4 sm:$0xff]  }
  0xa6   :  { %1022 = vmatpush2.bf16.msra.mxu1 %v2467_v59  ;;  %982 = vmatprep.subr.bf16.mxu0 %v2472_v60  ;;  %v2530_v59 = vld [vmem:[#allocation8 + $0x120] ss:$16 sps:$4 sm:$0xff]   ;;  %v2535_v60 = vld [vmem:[#allocation8 + $0x104] ss:$16 sps:$4 sm:$0xff]  }
  0xa7   :  { %1023 = vmatprep.subr.bf16.mxu1 %v2475_v61  ;;  %v2602_v61 = vld [vmem:[#allocation8 + $0x380] ss:$16 sps:$4 sm:$0xff]  }
  0xa9   :  { %983 = vmatpush2.bf16.msra.mxu0 %v2470_v62  ;;  %v2604_v62 = vld [vmem:[#allocation8 + $0x384] ss:$16 sps:$4 sm:$0xff]  }
  0xaa   :  { %1024 = vmatpush2.bf16.msra.mxu1 %v2473_v63  ;;  %984 = vmatprep.subr.bf16.mxu0 %v2478_v0  ;;  %v2533_v63 = vld [vmem:[#allocation8 + $0x100] ss:$16 sps:$4 sm:$0xff]   ;;  %v2541_v0 = vld [vmem:[#allocation8 + $0xec] ss:$16 sps:$4 sm:$0xff]  }
  0xab   :  { %1025 = vmatprep.subr.bf16.mxu1 %v2481_v1  ;;  %v2608_v1 = vld [vmem:[#allocation8 + $0x360] ss:$16 sps:$4 sm:$0xff]  }
  0xad   :  { %985 = vmatpush2.bf16.msra.mxu0 %v2476_v2  ;;  %v2610_v2 = vld [vmem:[#allocation8 + $0x364] ss:$16 sps:$4 sm:$0xff]  }
  0xae   :  { %1026 = vmatpush2.bf16.msra.mxu1 %v2479_v3  ;;  %986 = vmatprep.subr.bf16.mxu0 %v2484_v4  ;;  %v2616_v3 = vld [vmem:[#allocation8 + $0x344] ss:$16 sps:$4 sm:$0xff]   ;;  %v2614_v4 = vld [vmem:[#allocation8 + $0x340] ss:$16 sps:$4 sm:$0xff]  }
  0xaf   :  { %1027 = vmatprep.subr.bf16.mxu1 %v2487_v5  ;;  %v2622_v5 = vld [vmem:[#allocation8 + $0x324] ss:$16 sps:$4 sm:$0xff]  }
  0xb1   :  { %987 = vmatpush2.bf16.msra.mxu0 %v2482_v6  ;;  %v2620_v6 = vld [vmem:[#allocation8 + $0x320] ss:$16 sps:$4 sm:$0xff]  }
  0xb2   :  { %1028 = vmatpush2.bf16.msra.mxu1 %v2485_v7  ;;  %1840 = vmatprep.subr.bf16.mxu0 %v2490_v10  ;;  %v2628_v7 = vld [vmem:[#allocation8 + $0x304] ss:$16 sps:$4 sm:$0xff]   ;;  %v2626_v10 = vld [vmem:[#allocation8 + $0x300] ss:$16 sps:$4 sm:$0xff]  }
  0xb3   :  { %1881 = vmatprep.subr.bf16.mxu1 %v2538_v19 }
  0xb4   :  { %989 = vmatmul.mubr.bf16.vlgmr.msra.gmra.mxu0 %v2843_v8  ;;  %v2505_v8 = vld [vmem:[#allocation8 + $0x44] ss:$16 sps:$4 sm:$0xff]  }
  0xb5   :  { %1030 = vmatmul.mubr.bf16.vlgmr.msra.gmra.mxu1 %v2845_v9  ;;  %1841 = vmatpush1.bf16.msra.mxu0 %v2488_v11  ;;  %v2542_v9 = vld [vmem:[#allocation8 + $0x2c0] ss:$16 sps:$4 sm:$0xff]   ;;  %v2634_v11 = vld [vmem:[#allocation8 + $0x2ec] ss:$16 sps:$4 sm:$0xff]  }
  0xb6   :  { %1842 = vmatprep.subr.bf16.mxu0 %v2493_v12  ;;  %1882 = vmatpush1.bf16.msra.mxu1 %v2536_v20  ;;  %v214_v12 = vlaneseq }
  0xb7   :  { %1883 = vmatprep.subr.bf16.mxu1 %v2544_v22 }
  0xb9   :  { %1843 = vmatpush1.bf16.msra.mxu0 %v2491_v13  ;;  %v2851_v13 = vshrl.u32 %v214_v12, 7  ;;  %v2623_v12 = vld [vmem:[#allocation8 + $0x128] ss:$16 sps:$4 sm:$0xff]  }
  0xba   :  { %1844 = vmatprep.subr.bf16.mxu0 %v2496_v14  ;;  %1884 = vmatpush1.bf16.msra.mxu1 %v2542_v9 }
  0xbb   :  { %1885 = vmatprep.subr.bf16.mxu1 %v2550_v26  ;;  %v216_v14 = vsub.s32 0, %v2851_v13 }
  0xbd   :  { %1845 = vmatpush1.bf16.msra.mxu0 %v2494_v15  ;;  %v2854_v15 = vld [vmem:[#allocation7] sm:$0xf] }
  0xbe   :  { %1846 = vmatprep.subr.bf16.mxu0 %v2499_v16  ;;  %1886 = vmatpush1.bf16.msra.mxu1 %v2548_v25  ;;  %v220_v16 = vsub.s32 1, %v2851_v13 }
  0xbf   :  { %1887 = vmatprep.subr.bf16.mxu1 %v2556_v30 }
  0xc1   :  { %1847 = vmatpush1.bf16.msra.mxu0 %v2497_v17  ;;  %v217_v17 = vrot.slane %v2854_v15, %v216_v14 }
  0xc2   :  { %1848 = vmatprep.subr.bf16.mxu0 %v2502_v18  ;;  %1888 = vmatpush1.bf16.msra.mxu1 %v2554_v29  ;;  %v221_v18 = vrot.slane %v2854_v15, %v220_v16 }
  0xc3   :  { %1889 = vmatprep.subr.bf16.mxu1 %v2562_v34  ;;  %v2539_v34 = vld [vmem:[#allocation8 + $0xe8] ss:$16 sps:$4 sm:$0xff]  }
  0xc5   :  { %1849 = vmatpush1.bf16.msra.mxu0 %v2500_v21 }
  0xc6   :  { %1850 = vmatprep.subr.bf16.mxu0 %v2505_v8  ;;  %1890 = vmatpush1.bf16.msra.mxu1 %v2560_v33 }
  0xc7   :  { %1891 = vmatprep.subr.bf16.mxu1 %v2568_v38  ;;  %v2553_v38 = vld [vmem:[#allocation8 + $0xac] ss:$16 sps:$4 sm:$0xff]  }
  0xc9   :  { %1851 = vmatpush1.bf16.msra.mxu0 %v2503_v23 }
  0xca   :  { %1852 = vmatprep.subr.bf16.mxu0 %v2508_v24  ;;  %1892 = vmatpush1.bf16.msra.mxu1 %v2566_v37  ;;  %v2545_v37 = vld [vmem:[#allocation8 + $0xc8] ss:$16 sps:$4 sm:$0xff]  }
  0xcb   :  { %1893 = vmatprep.subr.bf16.mxu1 %v2574_v42  ;;  %v2565_v42 = vld [vmem:[#allocation8 + $0x6c] ss:$16 sps:$4 sm:$0xff]  }
  0xcd   :  { %1853 = vmatpush1.bf16.msra.mxu0 %v2506_v27 }
  0xce   :  { %1854 = vmatprep.subr.bf16.mxu0 %v2511_v28  ;;  %1894 = vmatpush1.bf16.msra.mxu1 %v2572_v41  ;;  %v2557_v41 = vld [vmem:[#allocation8 + $0x88] ss:$16 sps:$4 sm:$0xff]  }
  0xcf   :  { %1895 = vmatprep.subr.bf16.mxu1 %v2580_v46  ;;  %v2577_v46 = vld [vmem:[#allocation8 + $0x2c] ss:$16 sps:$4 sm:$0xff]  }
  0xd1   :  { %1855 = vmatpush1.bf16.msra.mxu0 %v2509_v31 }
  0xd2   :  { %1856 = vmatprep.subr.bf16.mxu0 %v2514_v32  ;;  %1896 = vmatpush1.bf16.msra.mxu1 %v2578_v45  ;;  %v2569_v45 = vld [vmem:[#allocation8 + $0x48] ss:$16 sps:$4 sm:$0xff]  }
  0xd3   :  { %1897 = vmatprep.subr.bf16.mxu1 %v2586_v50  ;;  %v2589_v50 = vld [vmem:[#allocation8 + $0x1ec] ss:$16 sps:$4 sm:$0xff]  }
  0xd5   :  { %1857 = vmatpush2.bf16.msra.mxu0 %v2512_v35 }
  0xd6   :  { %1858 = vmatprep.subr.bf16.mxu0 %v2517_v36  ;;  %1898 = vmatpush2.bf16.msra.mxu1 %v2584_v49  ;;  %v2547_v36 = vld [vmem:[#allocation8 + $0xcc] ss:$16 sps:$4 sm:$0xff]   ;;  %v2581_v49 = vld [vmem:[#allocation8 + $0x8] ss:$16 sps:$4 sm:$0xff]  }
  0xd7   :  { %1899 = vmatprep.subr.bf16.mxu1 %v2592_v54  ;;  %v2601_v54 = vld [vmem:[#allocation8 + $0x1ac] ss:$16 sps:$4 sm:$0xff]  }
  0xd9   :  { %1859 = vmatpush2.bf16.msra.mxu0 %v2515_v39  ;;  %v2551_v39 = vld [vmem:[#allocation8 + $0xa8] ss:$16 sps:$4 sm:$0xff]  }
  0xda   :  { %1860 = vmatprep.subr.bf16.mxu0 %v2520_v40  ;;  %1900 = vmatpush2.bf16.msra.mxu1 %v2590_v53  ;;  %v2559_v40 = vld [vmem:[#allocation8 + $0x8c] ss:$16 sps:$4 sm:$0xff]   ;;  %v2593_v53 = vld [vmem:[#allocation8 + $0x1c8] ss:$16 sps:$4 sm:$0xff]  }
  0xdb   :  { %1901 = vmatprep.subr.bf16.mxu1 %v2598_v58  ;;  %v2613_v58 = vld [vmem:[#allocation8 + $0x16c] ss:$16 sps:$4 sm:$0xff]  }
  0xdd   :  { %1861 = vmatpush2.bf16.msra.mxu0 %v2518_v43  ;;  %v2563_v43 = vld [vmem:[#allocation8 + $0x68] ss:$16 sps:$4 sm:$0xff]  }
  0xde   :  { %1862 = vmatprep.subr.bf16.mxu0 %v2523_v44  ;;  %1902 = vmatpush2.bf16.msra.mxu1 %v2596_v57  ;;  %v2571_v44 = vld [vmem:[#allocation8 + $0x4c] ss:$16 sps:$4 sm:$0xff]   ;;  %v2605_v57 = vld [vmem:[#allocation8 + $0x188] ss:$16 sps:$4 sm:$0xff]  }
  0xdf   :  { %1903 = vmatprep.subr.bf16.mxu1 %v2604_v62  ;;  %v2619_v62 = vld [vmem:[#allocation8 + $0x14c] ss:$16 sps:$4 sm:$0xff]  }
  0xe1   :  { %1863 = vmatpush2.bf16.msra.mxu0 %v2521_v47  ;;  %v2575_v47 = vld [vmem:[#allocation8 + $0x28] ss:$16 sps:$4 sm:$0xff]  }
  0xe2   :  { %1864 = vmatprep.subr.bf16.mxu0 %v2526_v48  ;;  %1904 = vmatpush2.bf16.msra.mxu1 %v2602_v61  ;;  %v2583_v48 = vld [vmem:[#allocation8 + $0xc] ss:$16 sps:$4 sm:$0xff]   ;;  %v228_v61 = vsub.s32 3, %v2851_v13 }
  0xe3   :  { %1905 = vmatprep.subr.bf16.mxu1 %v2610_v2 }
  0xe5   :  { %1865 = vmatpush2.bf16.msra.mxu0 %v2524_v51  ;;  %v2587_v51 = vld [vmem:[#allocation8 + $0x1e8] ss:$16 sps:$4 sm:$0xff]  }
  0xe6   :  { %1866 = vmatprep.subr.bf16.mxu0 %v2529_v52  ;;  %1906 = vmatpush2.bf16.msra.mxu1 %v2608_v1  ;;  %v2595_v52 = vld [vmem:[#allocation8 + $0x1cc] ss:$16 sps:$4 sm:$0xff]   ;;  %v229_v1 = vrot.slane %v2854_v15, %v228_v61 }
  0xe7   :  { %1907 = vmatprep.subr.bf16.mxu1 %v2616_v3 }
  0xe9   :  { %1867 = vmatpush2.bf16.msra.mxu0 %v2527_v55  ;;  %v2599_v55 = vld [vmem:[#allocation8 + $0x1a8] ss:$16 sps:$4 sm:$0xff]  }
  0xea   :  { %1868 = vmatprep.subr.bf16.mxu0 %v2532_v56  ;;  %1908 = vmatpush2.bf16.msra.mxu1 %v2614_v4  ;;  %v2607_v56 = vld [vmem:[#allocation8 + $0x18c] ss:$16 sps:$4 sm:$0xff]  }
  0xeb   :  { %1909 = vmatprep.subr.bf16.mxu1 %v2622_v5  ;;  %v2625_v4 = vld [vmem:[#allocation8 + $0x12c] ss:$16 sps:$4 sm:$0xff]  }
  0xed   :  { %1869 = vmatpush2.bf16.msra.mxu0 %v2530_v59  ;;  %v224_v59 = vsub.s32 2, %v2851_v13 }
  0xee   :  { %1870 = vmatprep.subr.bf16.mxu0 %v2535_v60  ;;  %1910 = vmatpush2.bf16.msra.mxu1 %v2620_v6  ;;  %v2611_v60 = vld [vmem:[#allocation8 + $0x168] ss:$16 sps:$4 sm:$0xff]  }
  0xef   :  { %1911 = vmatprep.subr.bf16.mxu1 %v2628_v7 }
  0xf1   :  { %1871 = vmatpush2.bf16.msra.mxu0 %v2533_v63  ;;  %v225_v63 = vrot.slane %v2854_v15, %v224_v59 }
  0xf2   :  { %1922 = vmatprep.subr.bf16.mxu0 %v2541_v0  ;;  %1912 = vmatpush2.bf16.msra.mxu1 %v2626_v10  ;;  %v2617_v0 = vld [vmem:[#allocation8 + $0x148] ss:$16 sps:$4 sm:$0xff]  }
  0xf3   :  { %1963 = vmatprep.subr.bf16.mxu1 %v2634_v11 }
 0x134   :  { %v908_v19 = vpop.f32.mrf.mxu0 }
 0x135   :  { %v949_v20 = vpop.f32.mrf.mxu1  ;;  %v909_v21 = vadd.f32 %v908_v19, %v217_v17  ;;  %v2631_v19 = vld [vmem:[#allocation8 + $0x10c] ss:$16 sps:$4 sm:$0xff]  }
 0x136   :  { %v910_v8 = vpop.f32.mrf.mxu0 }
 0x137   :  { %v951_v9 = vpop.f32.mrf.mxu1  ;;  %v950_v22 = vadd.f32 %v949_v20, %v909_v21  ;;  %v911_v23 = vadd.f32 %v910_v8, %v221_v18 }
 0x138   :  { %v912_v24 = vpop.f32.mrf.mxu0 }
 0x139   :  { %v953_v25 = vpop.f32.mrf.mxu1  ;;  %v1038_v26 = vmul.f32 0.2, %v950_v22  ;;  %v952_v27 = vadd.f32 %v951_v9, %v911_v23 }
 0x13a   :  { %v913_v28 = vpop.f32.mrf.mxu0 }
 0x13b   :  { %v954_v29 = vpop.f32.mrf.mxu1  ;;  %v1039_v30 = vmul.f32 0.2, %v952_v27  ;;  %v1042_v31 = vmax.f32 %v950_v22, %v1038_v26  ;;  %v2629_v22 = vld [vmem:[#allocation8 + $0x108] ss:$16 sps:$4 sm:$0xff]   ;;  %v2637_v28 = vld [vmem:[#allocation8 + $0x2cc] ss:$16 sps:$4 sm:$0xff]  }
 0x13c   :  { %v2632_v26 = vld [vmem:[#allocation8 + $0x2e8] ss:$16 sps:$4 sm:$0xff]  }
 0x13d   :  { %v1043_v32 = vmax.f32 %v952_v27, %v1039_v30  ;;  %v2863_v35 = vpack.c.bf16 %v1042_v31, %v1042_v31  ;;  %v2635_v29 = vld [vmem:[#allocation8 + $0x2c8] ss:$16 sps:$4 sm:$0xff]   ;;  %v2640_v30 = vld [vmem:[#allocation8 + $0x2ac] ss:$16 sps:$4 sm:$0xff]  }
 0x13e   :  { %v2638_v31 = vld [vmem:[#allocation8 + $0x2a8] ss:$16 sps:$4 sm:$0xff]  }
 0x13f   :  { %v1047_v33 = vpack.c.bf16 %v1043_v32, %v1043_v32  ;;  %v2643_v32 = vld [vmem:[#allocation8 + $0x28c] ss:$16 sps:$4 sm:$0xff]  }
 0x141   :  { %1872 = vmatprep.mubr.bf16.mxu0 %v1047_v33 }
 0x142   :  { %1873 = vmatmul.mubr.bf16.vlgmr.msra.gmra.mxu0 %v2863_v35 }
 0x143   :  { %1923 = vmatpush1.bf16.msra.mxu0 %v2539_v34  ;;  %1954 = vmatprep.mubr.bf16.mxu0 %v1047_v33  ;;  %v2641_v33 = vld [vmem:[#allocation8 + $0x288] ss:$16 sps:$4 sm:$0xff]   ;;  %v2646_v34 = vld [vmem:[#allocation8 + $0x26c] ss:$16 sps:$4 sm:$0xff]  }
 0x144   :  { %1924 = vmatprep.subr.bf16.mxu0 %v2547_v36  ;;  %v2644_v36 = vld [vmem:[#allocation8 + $0x268] ss:$16 sps:$4 sm:$0xff]  }
 0x147   :  { %1925 = vmatpush1.bf16.msra.mxu0 %v2545_v37  ;;  %v2649_v37 = vld [vmem:[#allocation8 + $0x24c] ss:$16 sps:$4 sm:$0xff]  }
 0x148   :  { %1926 = vmatprep.subr.bf16.mxu0 %v2553_v38  ;;  %v2652_v38 = vld [vmem:[#allocation8 + $0x22c] ss:$16 sps:$4 sm:$0xff]  }
 0x14b   :  { %1927 = vmatpush1.bf16.msra.mxu0 %v2551_v39  ;;  %v2650_v39 = vld [vmem:[#allocation8 + $0x228] ss:$16 sps:$4 sm:$0xff]  }
 0x14c   :  { %1928 = vmatprep.subr.bf16.mxu0 %v2559_v40  ;;  %v2655_v40 = vld [vmem:[#allocation8 + $0x20c] ss:$16 sps:$4 sm:$0xff]  }
 0x14f   :  { %1929 = vmatpush1.bf16.msra.mxu0 %v2557_v41  ;;  %v2653_v41 = vld [vmem:[#allocation8 + $0x208] ss:$16 sps:$4 sm:$0xff]  }
 0x150   :  { %1930 = vmatprep.subr.bf16.mxu0 %v2565_v42  ;;  %v2658_v42 = vld [vmem:[#allocation8 + $0x3ec] ss:$16 sps:$4 sm:$0xff]  }
 0x153   :  { %1931 = vmatpush1.bf16.msra.mxu0 %v2563_v43  ;;  %v2656_v43 = vld [vmem:[#allocation8 + $0x3e8] ss:$16 sps:$4 sm:$0xff]  }
 0x154   :  { %1932 = vmatprep.subr.bf16.mxu0 %v2571_v44  ;;  %v2661_v44 = vld [vmem:[#allocation8 + $0x3cc] ss:$16 sps:$4 sm:$0xff]  }
 0x157   :  { %1933 = vmatpush1.bf16.msra.mxu0 %v2569_v45  ;;  %v2659_v45 = vld [vmem:[#allocation8 + $0x3c8] ss:$16 sps:$4 sm:$0xff]  }
 0x158   :  { %1934 = vmatprep.subr.bf16.mxu0 %v2577_v46  ;;  %v2664_v46 = vld [vmem:[#allocation8 + $0x3ac] ss:$16 sps:$4 sm:$0xff]  }
 0x15b   :  { %1935 = vmatpush1.bf16.msra.mxu0 %v2575_v47  ;;  %v2662_v47 = vld [vmem:[#allocation8 + $0x3a8] ss:$16 sps:$4 sm:$0xff]  }
 0x15c   :  { %1936 = vmatprep.subr.bf16.mxu0 %v2583_v48  ;;  %v2667_v48 = vld [vmem:[#allocation8 + $0x38c] ss:$16 sps:$4 sm:$0xff]  }
 0x15f   :  { %1937 = vmatpush1.bf16.msra.mxu0 %v2581_v49  ;;  %v2665_v49 = vld [vmem:[#allocation8 + $0x388] ss:$16 sps:$4 sm:$0xff]  }
 0x160   :  { %1938 = vmatprep.subr.bf16.mxu0 %v2589_v50  ;;  %v2670_v50 = vld [vmem:[#allocation8 + $0x36c] ss:$16 sps:$4 sm:$0xff]  }
 0x163   :  { %1939 = vmatpush2.bf16.msra.mxu0 %v2587_v51  ;;  %v2668_v51 = vld [vmem:[#allocation8 + $0x368] ss:$16 sps:$4 sm:$0xff]  }
 0x164   :  { %1940 = vmatprep.subr.bf16.mxu0 %v2595_v52  ;;  %v2673_v52 = vld [vmem:[#allocation8 + $0x34c] ss:$16 sps:$4 sm:$0xff]  }
 0x167   :  { %1941 = vmatpush2.bf16.msra.mxu0 %v2593_v53  ;;  %v2671_v53 = vld [vmem:[#allocation8 + $0x348] ss:$16 sps:$4 sm:$0xff]  }
 0x168   :  { %1942 = vmatprep.subr.bf16.mxu0 %v2601_v54  ;;  %v2676_v54 = vld [vmem:[#allocation8 + $0x32c] ss:$16 sps:$4 sm:$0xff]  }
 0x16b   :  { %1943 = vmatpush2.bf16.msra.mxu0 %v2599_v55  ;;  %v2674_v55 = vld [vmem:[#allocation8 + $0x328] ss:$16 sps:$4 sm:$0xff]  }
 0x16c   :  { %1944 = vmatprep.subr.bf16.mxu0 %v2607_v56  ;;  %v2679_v56 = vld [vmem:[#allocation8 + $0x30c] ss:$16 sps:$4 sm:$0xff]  }
 0x16f   :  { %1945 = vmatpush2.bf16.msra.mxu0 %v2605_v57  ;;  %v2677_v57 = vld [vmem:[#allocation8 + $0x308] ss:$16 sps:$4 sm:$0xff]  }
 0x170   :  { %1946 = vmatprep.subr.bf16.mxu0 %v2613_v58 }
 0x173   :  { %1947 = vmatpush2.bf16.msra.mxu0 %v2611_v60 }
 0x174   :  { %v990_v2 = vpop.f32.mrf.mxu0  ;;  %1948 = vmatprep.subr.bf16.mxu0 %v2619_v62 }
 0x175   :  { %v1031_v3 = vpop.f32.mrf.mxu1  ;;  %v991_v5 = vadd.f32 %v990_v2, %v225_v63 }
 0x176   :  { %v992_v6 = vpop.f32.mrf.mxu0 }
 0x177   :  { %v1033_v7 = vpop.f32.mrf.mxu1  ;;  %v1032_v10 = vadd.f32 %v1031_v3, %v991_v5  ;;  %v993_v11 = vadd.f32 %v992_v6, %v229_v1  ;;  %1949 = vmatpush2.bf16.msra.mxu0 %v2617_v0  ;;  %v1178_v0 = vld [vmem:[%s2897_s4] sm:$0xf]  ;;  %s2794_s4 = smov [#allocation10]  }
 0x178   :  { %v994_v17 = vpop.f32.mrf.mxu0  ;;  %1950 = vmatprep.subr.bf16.mxu0 %v2625_v4  ;;  %v1183_v1 = vrot.slane %v1178_v0, %v216_v14  ;;  %v1187_v2 = vrot.slane %v1178_v0, %v220_v16  ;;  %v1191_v3 = vrot.slane %v1178_v0, %v224_v59  ;;  %v1195_v16 = vrot.slane %v1178_v0, %v228_v61  ;;  %s2020_s13 = sshll.u32 %s2794_s4, 4  ;;  %s2021_s13 = int_to_ptr.vmem [resolvable:$true] %s2020_s13 }
 0x179   :  { %v1035_v18 = vpop.f32.mrf.mxu1  ;;  %v1040_v20 = vmul.f32 0.2, %v1032_v10  ;;  %v1034_v21 = vadd.f32 %v1033_v7, %v993_v11  ;;  %s2760_s14 = scalar_lea.vmem %s2021_s13, 256  ;;  %p2765_p7 = scmp.lt.s32.totalorder %s2021_s13, %s2021_s13 }
 0x17a   :  { %v995_v8 = vpop.f32.mrf.mxu0  ;;  %p2761_p6 = scmp.ne.s32.totalorder %s2021_s13, %s2760_s14  ;;  %p2766_p8 = scmp.lt.s32.totalorder %s2760_s14, %s2760_s14 }
 0x17b   :  { %v1036_v9 = vpop.f32.mrf.mxu1  ;;  %v1041_v15 = vmul.f32 0.2, %v1034_v21  ;;  %1951 = vmatpush2.bf16.msra.mxu0 %v2623_v12  ;;  %v1044_v23 = vmax.f32 %v1032_v10, %v1040_v20 }
 0x17c   :  { %1952 = vmatprep.subr.bf16.mxu0 %v2631_v19  ;;  %p2767_p9 = por %p2766_p8, %p2765_p7 }
 0x17d   :  { %v1045_v24 = vmax.f32 %v1034_v21, %v1041_v15  ;;  %v2874_v27 = vpack.c.bf16 %v1044_v23, %v1044_v23 }
 0x17e   :  { %p2768_p10 = pnand %p2767_p9, %p2761_p6 }
 0x17f   :  { %v1049_v25 = vpack.c.bf16 %v1045_v24, %v1045_v24  ;;  %1953 = vmatpush2.bf16.msra.mxu0 %v2629_v22 }
 0x181   :  { %1913 = vmatprep.mubr.bf16.mxu1 %v1049_v25 }
 0x182   :  { %1955 = vmatmul.mubr.bf16.vlgmr.msra.gmra.mxu0 %v2863_v35  ;;  %1914 = vmatmul.mubr.bf16.vlgmr.msra.gmra.mxu1 %v2874_v27  ;;  %v2647_v35 = vld [vmem:[#allocation8 + $0x248] ss:$16 sps:$4 sm:$0xff]  }
 0x183   :  { %1964 = vmatpush1.bf16.msra.mxu1 %v2632_v26  ;;  %1995 = vmatprep.mubr.bf16.mxu1 %v1049_v25 }
 0x184   :  { %1965 = vmatprep.subr.bf16.mxu1 %v2637_v28 }
 0x187   :  { %1966 = vmatpush1.bf16.msra.mxu1 %v2635_v29 }
 0x188   :  { %1967 = vmatprep.subr.bf16.mxu1 %v2640_v30 }
 0x18b   :  { %1968 = vmatpush1.bf16.msra.mxu1 %v2638_v31 }
 0x18c   :  { %1969 = vmatprep.subr.bf16.mxu1 %v2643_v32 }
 0x18f   :  { %1970 = vmatpush1.bf16.msra.mxu1 %v2641_v33 }
 0x190   :  { %1971 = vmatprep.subr.bf16.mxu1 %v2646_v34 }
 0x193   :  { %1972 = vmatpush1.bf16.msra.mxu1 %v2644_v36 }
 0x194   :  { %1973 = vmatprep.subr.bf16.mxu1 %v2649_v37 }
 0x197   :  { %1974 = vmatpush1.bf16.msra.mxu1 %v2647_v35 }
 0x198   :  { %1975 = vmatprep.subr.bf16.mxu1 %v2652_v38 }
 0x19b   :  { %1976 = vmatpush1.bf16.msra.mxu1 %v2650_v39 }
 0x19c   :  { %1977 = vmatprep.subr.bf16.mxu1 %v2655_v40 }
 0x19f   :  { %1978 = vmatpush1.bf16.msra.mxu1 %v2653_v41 }
 0x1a0   :  { %1979 = vmatprep.subr.bf16.mxu1 %v2658_v42 }
 0x1a3   :  { %1980 = vmatpush2.bf16.msra.mxu1 %v2656_v43 }
 0x1a4   :  { %1981 = vmatprep.subr.bf16.mxu1 %v2661_v44 }
 0x1a7   :  { %1982 = vmatpush2.bf16.msra.mxu1 %v2659_v45 }
 0x1a8   :  { %1983 = vmatprep.subr.bf16.mxu1 %v2664_v46 }
 0x1ab   :  { %1984 = vmatpush2.bf16.msra.mxu1 %v2662_v47 }
 0x1ac   :  { %1985 = vmatprep.subr.bf16.mxu1 %v2667_v48 }
 0x1af   :  { %1986 = vmatpush2.bf16.msra.mxu1 %v2665_v49 }
 0x1b0   :  { %1987 = vmatprep.subr.bf16.mxu1 %v2670_v50 }
 0x1b3   :  { %1988 = vmatpush2.bf16.msra.mxu1 %v2668_v51 }
 0x1b4   :  { %1989 = vmatprep.subr.bf16.mxu1 %v2673_v52 }
 0x1b7   :  { %1990 = vmatpush2.bf16.msra.mxu1 %v2671_v53 }
 0x1b8   :  { %1991 = vmatprep.subr.bf16.mxu1 %v2676_v54 }
 0x1bb   :  { %1992 = vmatpush2.bf16.msra.mxu1 %v2674_v55 }
 0x1bc   :  { %1993 = vmatprep.subr.bf16.mxu1 %v2679_v56 }
 0x1bf   :  { %1994 = vmatpush2.bf16.msra.mxu1 %v2677_v57 }
 0x1c2   :  { %1996 = vmatmul.mubr.bf16.vlgmr.msra.gmra.mxu1 %v2874_v27 }
 0x202   :  { %v1874_v58 = vpop.f32.mrf.mxu0 }
 0x203   :  { %v1875_v6 = vadd.f32 %v1874_v58, %v1183_v1 }
 0x204   :  { %v1876_v60 = vpop.f32.mrf.mxu0 }
 0x205   :  { %v1877_v7 = vadd.f32 %v1876_v60, %v1187_v2 }
 0x206   :  { %v1878_v62 = vpop.f32.mrf.mxu0 }
 0x208   :  { %v1879_v63 = vpop.f32.mrf.mxu0 }
 0x242   :  { %v1956_v4 = vpop.f32.mrf.mxu0  ;;  %v1915_v5 = vpop.f32.mrf.mxu1 }
 0x243   :  { %v1957_v10 = vadd.f32 %v1956_v4, %v1191_v3  ;;  %v1916_v17 = vadd.f32 %v1915_v5, %v1875_v6 }
 0x244   :  { %v1958_v11 = vpop.f32.mrf.mxu0  ;;  %v1917_v12 = vpop.f32.mrf.mxu1 }
 0x245   :  { %v1918_v18 = vadd.f32 %v1917_v12, %v1877_v7  ;;  %v1959_v59 = vadd.f32 %v1958_v11, %v1195_v16 }
 0x246   :  { %v1960_v19 = vpop.f32.mrf.mxu0  ;;  %v1919_v20 = vpop.f32.mrf.mxu1 }
 0x247   :  { %v2008_v21 = vcombine.low %v1916_v17, %v1918_v18 }
 0x248   :  { %v1961_v8 = vpop.f32.mrf.mxu0  ;;  %v1920_v14 = vpop.f32.mrf.mxu1 }
 0x249   :  { %2012 = vst [vmem:[#allocation10] sm:$0xff] %v2008_v21 }
 0x282   :  { %v1997_v9 = vpop.f32.mrf.mxu1 }
 0x283   :  { %v1998_v22 = vadd.f32 %v1997_v9, %v1957_v10 }
 0x284   :  { %v1999_v15 = vpop.f32.mrf.mxu1 }
 0x285   :  { %v2000_v23 = vadd.f32 %v1999_v15, %v1959_v59 }
 0x286   :  { %v2001_v24 = vpop.f32.mrf.mxu1 }
 0x287   :  { %v2009_v25 = vcombine.low %v1998_v22, %v2000_v23 }
 0x288   :  { %v2002_v26 = vpop.f32.mrf.mxu1 }
 0x289   :  { %2013 = vst [vmem:[#allocation10 + $0x8] sm:$0xff] %v2009_v25 }
 0x28a   :  { %2771 = shalt.err (!%p2768_p10)
}
 0x28b   :  { %2023 = dma.vmem_to_hbm [thread:$0]  %s2021_s13, 256, %s2898_s5, [#allocation4]  }
 0x28c   :  { %2786 = dma.done.wait [#allocation4], 256  }
 0x28d   :  { %2787 = vsyncadd [#allocation4], 4294967040 }
 0x28e   :  { %2027 = vsyncpa [#allocation3], 1 }
 0x28f   :  { %2028 = vsyncpa [#allocation6], 1 }
 0x290   :  { %2029 = vsyncpa [#allocation9], 1 }
 0x291   :  { %2030 = vsyncpa [#allocation4], 1 }

</bundles_post_ra>
